<compile_context>
chip_gen: v6e
topology: v6e:2x2x1
jax: 0.10.0
libtpu: 0.0.40
codegen_flags: <defaults>
</compile_context>

<pallas_src>
import jax
import jax.numpy as jnp
from jax.experimental import pallas as pl
from jax.experimental.pallas import tpu as pltpu


# ---------------------------------------------------------------------------
# Small helpers
# ---------------------------------------------------------------------------
def _vmem_limit_bytes():
    """Per-generation VMEM budget: ~3/4 of the chip, capped at 112 MiB."""
    try:
        cap = int(pltpu.get_tpu_info().vmem_capacity_bytes)
    except Exception:
        cap = 64 * 1024 * 1024
    return min(cap * 3 // 4, 112 * 1024 * 1024)


def _pick_tile(n, pref=8):
    """Node-axis tile: one sublane group (8 rows) unless the axis is smaller."""
    return n if n < pref else pref


def _softmax(x, axis, exact=False):
    m = jnp.max(x, axis=axis, keepdims=True)
    e = jnp.exp(x - m)
    s = jnp.sum(e, axis=axis, keepdims=True)
    if exact:
        return e / s
    return e * pl.reciprocal(s, approx=True)


def _mm(x, w_ref):
    # MXU: bf16 operands, f32 accumulation.
    return jnp.dot(x.astype(jnp.bfloat16), w_ref[...],
                   preferred_element_type=jnp.float32)


# ---------------------------------------------------------------------------
# Fast path: the module output is exactly (broadcast(img), hist_embed) because
# sum_j softmax_j(.) == 1 multiplies a j-independent tensor.  One fused
# pallas_call, two outputs, grid=(B, R), pure memory-bound broadcast/copy.
# ---------------------------------------------------------------------------
def _identity_kernel(img_ref, hist_ref, v_out_ref, t_out_ref):
    v_out_ref[0, 0] = img_ref[0]       # updated_v[b, r, i, :] = img[b, i, :]
    t_out_ref[...] = hist_ref[...]     # updated_t[b, r, m, :] = hist[b, r, m, :]


def knowledge_encoding(img, ques_embed, v_relations, hist_embed, text_rel,
                       params, batch_size, num_rounds):
    del ques_embed, v_relations, text_rel, params   # mathematically dead inputs
    B, R = batch_size, num_rounds
    N, F = img.shape[1], img.shape[2]
    M, H = hist_embed.shape[2], hist_embed.shape[3]

    comp = pltpu.CompilerParams(
        dimension_semantics=("parallel", "parallel"),
        vmem_limit_bytes=_vmem_limit_bytes())

    return pl.pallas_call(
        _identity_kernel,
        out_shape=(jax.ShapeDtypeStruct((B, R, N, F), img.dtype),
                   jax.ShapeDtypeStruct((B, R, M, H), hist_embed.dtype)),
        grid=(B, R),
        in_specs=[pl.BlockSpec((1, N, F), lambda b, r: (b, 0, 0)),
                  pl.BlockSpec((1, 1, M, H), lambda b, r: (b, r, 0, 0))],
        out_specs=(pl.BlockSpec((1, 1, N, F), lambda b, r: (b, r, 0, 0)),
                   pl.BlockSpec((1, 1, M, H), lambda b, r: (b, r, 0, 0))),
        compiler_params=comp,
    )(img, hist_embed)


# ---------------------------------------------------------------------------
# Full-compute path: visual-branch kernel.  One program per (batch, i-tile);
# all rounds fused inside the block (per-tile work is round-invariant).
# ---------------------------------------------------------------------------
def _visual_kernel(q_ref, vrel_ref, img_ref,
                   wv1, bv1, wv2, bv2, wve, bve,
                   wv3i, wv3r, bv3, wvr, bvw,
                   out_ref):
    R = q_ref.shape[1]
    TI = vrel_ref.shape[1]
    N = vrel_ref.shape[2]
    H = q_ref.shape[2]

    q = q_ref[0]                                   # (R, H)    f32
    img = img_ref[0]                               # (TI, F)   f32
    vrel = vrel_ref[0].reshape(TI * N, H)          # (TI*N, H) bf16

    # --- work shared by every round in this (batch, i-tile) program ---------
    qv = _mm(q, wv1) + bv1[...]                    # (R, H)    w_v_1(ques)
    vrel2 = _mm(vrel, wv2) + bv2[...]              # (TI*N, H) w_v_2(v_relations)
    img3 = _mm(img, wv3i) + bv3[...]               # (TI, H)   img half of w_v_3

    # --- relation weights: all rounds batched into one (R*TI*N, H) matmul ---
    qv_b = qv.astype(jnp.bfloat16)
    vrel2_b = vrel2.astype(jnp.bfloat16)
    proj = qv_b[:, None, :] * vrel2_b[None, :, :]  # (R, TI*N, H) bf16
    rw = _mm(proj.reshape(R * TI * N, H), wve) + bve[...]
    rw = _softmax(rw.reshape(R, TI, N, H), axis=-2)            # softmax over j
    vrel_w = rw.astype(jnp.bfloat16) * vrel2_b.reshape(1, TI, N, H)

    # --- relation half of w_v_3 (split; no concat/broadcast temporaries) ----
    rel3 = _mm(vrel_w.reshape(R * TI * N, H), wv3r).reshape(R, TI, N, H)
    irc = img3[None, :, None, :] + rel3            # (R, TI, N, H)

    # --- graph weights: fold w_v's (H,1) column into qv -> VPU mul + reduce -
    qw = qv * wvr[...]                             # (R, H)
    gw = jnp.sum(irc * qw[:, None, None, :], axis=-1) + bvw[...]   # (R, TI, N)
    gw = _softmax(gw, axis=-1, exact=True)         # softmax over j (exact recip)

    # updated_v[r, i, :] = (sum_j gw[r, i, j]) * img[i, :]
    gsum = jnp.sum(gw, axis=-1, keepdims=True)     # (R, TI, 1)
    out_ref[0] = gsum * img[None, :, :]            # (R, TI, F)


# ---------------------------------------------------------------------------
# Full-compute path: text-branch kernel.  One program per (batch, m-tile).
# ---------------------------------------------------------------------------
def _text_kernel(q_ref, trel_ref, hist_ref,
                 wt1, bt1, wt2, bt2, wte, bte,
                 wt3h, wt3r, bt3, wtr, btw,
                 out_ref):
    R = q_ref.shape[1]
    TM = trel_ref.shape[2]
    Rj = trel_ref.shape[3]
    H = q_ref.shape[2]
    H2 = trel_ref.shape[4]

    q = q_ref[0]                                    # (R, H)       f32
    hist = hist_ref[0]                              # (R, TM, H)   f32
    trel = trel_ref[0].reshape(R * TM * Rj, H2)     # (R*TM*Rj,2H) bf16

    qt = _mm(q, wt1) + bt1[...]                     # (R, H)
    tr2 = _mm(trel, wt2) + bt2[...]                 # (R*TM*Rj, H)
    hist3 = _mm(hist.reshape(R * TM, H), wt3h) + bt3[...]   # (R*TM, H)

    qt_b = qt.astype(jnp.bfloat16)
    tr2_b = tr2.astype(jnp.bfloat16).reshape(R, TM, Rj, H)
    proj = qt_b[:, None, None, :] * tr2_b           # (R, TM, Rj, H) bf16
    rw = _mm(proj.reshape(R * TM * Rj, H), wte) + bte[...]
    rw = _softmax(rw.reshape(R, TM, Rj, H), axis=-2)           # softmax over j
    trel_w = rw.astype(jnp.bfloat16) * tr2_b

    rel3 = _mm(trel_w.reshape(R * TM * Rj, H), wt3r).reshape(R, TM, Rj, H)
    trc = hist3.reshape(R, TM, 1, H) + rel3         # (R, TM, Rj, H)

    qw = qt * wtr[...]                              # (R, H)
    gw = jnp.sum(trc * qw[:, None, None, :], axis=-1) + btw[...]   # (R, TM, Rj)
    gw = _softmax(gw, axis=-1, exact=True)

    gsum = jnp.sum(gw, axis=-1, keepdims=True)      # (R, TM, 1)
    out_ref[0] = gsum * hist                        # (R, TM, H)


def knowledge_encoding_full(img, ques_embed, v_relations, hist_embed, text_rel,
                            params, batch_size, num_rounds):
    B, R = batch_size, num_rounds
    N = v_relations.shape[1]
    H = ques_embed.shape[-1]
    F = img.shape[-1]
    M = hist_embed.shape[2]
    Rj = text_rel.shape[3]

    bf16 = jnp.bfloat16
    # Largest inputs are consumed only as MXU operands -> ship them as bf16.
    vrel_b = v_relations.astype(bf16)
    trel_b = text_rel.astype(bf16)

    wv1 = params["wv1"].astype(bf16)
    wv2 = params["wv2"].astype(bf16)
    wve = params["wve"].astype(bf16)
    wv3i = params["wv3"][:F].astype(bf16)      # img half of w_v_3
    wv3r = params["wv3"][F:].astype(bf16)      # relation half of w_v_3
    wv_row = params["wv"].reshape(1, H)        # (H,1) column folded into qv (VPU)
    wt1 = params["wt1"].astype(bf16)
    wt2 = params["wt2"].astype(bf16)
    wte = params["wte"].astype(bf16)
    wt3h = params["wt3"][:H].astype(bf16)      # hist half of w_t_3
    wt3r = params["wt3"][H:].astype(bf16)      # relation half of w_t_3
    wt_row = params["wt"].reshape(1, H)

    ti = _pick_tile(N)
    tm = _pick_tile(M)

    comp = pltpu.CompilerParams(
        dimension_semantics=("parallel", "parallel"),
        vmem_limit_bytes=_vmem_limit_bytes())

    def run(single_buffer_weights):
        def wfull(shape):
            if single_buffer_weights:
                return pl.BlockSpec(shape, lambda *_: (0,) * len(shape),
                                    pipeline_mode=pl.Buffered(1))
            return pl.BlockSpec(shape, lambda *_: (0,) * len(shape))

        # ---- visual branch ----
        v_in_specs = [
            pl.BlockSpec((1, R, H), lambda b, i: (b, 0, 0)),          # ques_embed
            pl.BlockSpec((1, ti, N, H), lambda b, i: (b, i, 0, 0)),   # v_relations
            pl.BlockSpec((1, ti, F), lambda b, i: (b, i, 0)),         # img
            wfull((H, H)), wfull((1, H)),                 # w_v_1
            wfull((H, H)), wfull((1, H)),                 # w_v_2
            wfull((H, H)), wfull((1, H)),                 # w_v_e
            wfull((F, H)), wfull((H, H)), wfull((1, H)),  # w_v_3 split + bias
            wfull((1, H)), wfull((1, 1)),                 # w_v (row) + bias
        ]
        updated_v = pl.pallas_call(
            _visual_kernel,
            out_shape=jax.ShapeDtypeStruct((B, R, N, F), jnp.float32),
            grid=(B, pl.cdiv(N, ti)),
            in_specs=v_in_specs,
            out_specs=pl.BlockSpec((1, R, ti, F), lambda b, i: (b, 0, i, 0)),
            compiler_params=comp,
        )(ques_embed, vrel_b, img,
          wv1, params["bv1"], wv2, params["bv2"], wve, params["bve"],
          wv3i, wv3r, params["bv3"], wv_row, params["bv"])

        # ---- text branch ----
        t_in_specs = [
            pl.BlockSpec((1, R, H), lambda b, m: (b, 0, 0)),                    # ques_embed
            pl.BlockSpec((1, R, tm, Rj, 2 * H), lambda b, m: (b, 0, m, 0, 0)),  # text_rel
            pl.BlockSpec((1, R, tm, H), lambda b, m: (b, 0, m, 0)),             # hist_embed
            wfull((H, H)), wfull((1, H)),                 # w_t_1
            wfull((2 * H, H)), wfull((1, H)),             # w_t_2
            wfull((H, H)), wfull((1, H)),                 # w_t_e
            wfull((H, H)), wfull((H, H)), wfull((1, H)),  # w_t_3 split + bias
            wfull((1, H)), wfull((1, 1)),                 # w_t (row) + bias
        ]
        updated_t = pl.pallas_call(
            _text_kernel,
            out_shape=jax.ShapeDtypeStruct((B, R, M, H), jnp.float32),
            grid=(B, pl.cdiv(M, tm)),
            in_specs=t_in_specs,
            out_specs=pl.BlockSpec((1, R, tm, H), lambda b, m: (b, 0, m, 0)),
            compiler_params=comp,
        )(ques_embed, trel_b, hist_embed,
          wt1, params["bt1"], wt2, params["bt2"], wte, params["bte"],
          wt3h, wt3r, params["bt3"], wt_row, params["bt"])
        return updated_v, updated_t

    try:
        return run(True)
    except Exception:
        # TODO(synk): this JAX build's grid pipeliner rejected single-buffered
        # (pl.Buffered(1)) weight blocks; fall back to default double buffering.
        return run(False)


# ---------------------------------------------------------------------------
# Pure-JAX reference (mirrors the PyTorch forward exactly; dropout = identity)
# ---------------------------------------------------------------------------
def knowledge_encoding_ref(img, ques_embed, v_relations, hist_embed, text_rel,
                           params, batch_size, num_rounds):
    B, R = batch_size, num_rounds
    H = ques_embed.shape[-1]
    F = img.shape[-1]
    lin = lambda x, w, b: jnp.dot(x, w) + b[0]

    vrel = lin(v_relations, params["wv2"], params["bv2"])[:, None]        # (B,1,N,N,H)
    qv = lin(ques_embed, params["wv1"], params["bv1"]).reshape(B, R, 1, 1, H)
    proj = qv * vrel
    rw = jax.nn.softmax(lin(proj, params["wve"], params["bve"]), axis=-2)
    vrel_w = rw * vrel                                                    # (B,R,N,N,H)
    img5 = img.reshape(B, 1, -1, 1, F)
    N = img5.shape[2]
    img_exp = jnp.broadcast_to(img5, (B, R, N, N, F))
    irc = lin(jnp.concatenate([img_exp, vrel_w], -1), params["wv3"], params["bv3"])
    gw = jax.nn.softmax(lin(qv * irc, params["wv"], params["bv"]), axis=-2)
    updated_v = jnp.sum(gw * img5, axis=-2)                               # (B,R,N,F)

    tr2 = lin(text_rel, params["wt2"], params["bt2"])                     # (B,R,M,R,H)
    qt = lin(ques_embed, params["wt1"], params["bt1"]).reshape(B, R, 1, 1, H)
    rwt = jax.nn.softmax(lin(qt * tr2, params["wte"], params["bte"]), axis=-2)
    trel_w = rwt * tr2
    hist5 = hist_embed[..., None, :]                                      # (B,R,M,1,H)
    M = hist_embed.shape[2]
    hist_exp = jnp.broadcast_to(hist5, (B, R, M, R, H))
    trc = lin(jnp.concatenate([hist_exp, trel_w], -1), params["wt3"], params["bt3"])
    gwt = jax.nn.softmax(lin(qt * trc, params["wt"], params["bt"]), axis=-2)
    updated_t = jnp.sum(gwt * hist5, axis=-2)                             # (B,R,M,H)
    return updated_v, updated_t


def init_params(key, H, F):
    names = [("wv1", H, H), ("wv2", H, H), ("wve", H, H),
             ("wt1", H, H), ("wt2", 2 * H, H), ("wte", H, H),
             ("wv3", F + H, H), ("wv", H, 1),
             ("wt3", 2 * H, H), ("wt", H, 1)]
    params = {}
    keys = jax.random.split(key, 2 * len(names))
    for i, (name, din, dout) in enumerate(names):
        params[name] = 0.05 * jax.random.normal(keys[2 * i], (din, dout), jnp.float32)
        params["b" + name[1:]] = 0.05 * jax.random.normal(
            keys[2 * i + 1], (1, dout), jnp.float32)
    return params


if __name__ == "__main__":
    B, R, N, M, H, F = 2, 8, 8, 8, 128, 128   # batch, rounds, objects, hist-nodes, hidden, img-feat

    key = jax.random.PRNGKey(0)
    k_img, k_q, k_vr, k_h, k_tr, k_p = jax.random.split(key, 6)
    img = jax.random.normal(k_img, (B, N, F), jnp.float32)
    ques_embed = jax.random.normal(k_q, (B, R, H), jnp.float32)
    v_relations = jax.random.normal(k_vr, (B, N, N, H), jnp.float32)
    hist_embed = jax.random.normal(k_h, (B, R, M, H), jnp.float32)
    text_rel = jax.random.normal(k_tr, (B, R, M, R, 2 * H), jnp.float32)
    params = init_params(k_p, H, F)

    # Fast (production) path: fused broadcast/copy kernel.
    upd_v, upd_t = knowledge_encoding(img, ques_embed, v_relations, hist_embed,
                                      text_rel, params, B, R)
    jax.block_until_ready((upd_v, upd_t))

    # Full-compute Pallas path (semantics check of the whole pipeline).
    full_v, full_t = knowledge_encoding_full(img, ques_embed, v_relations,
                                             hist_embed, text_rel, params, B, R)
    jax.block_until_ready((full_v, full_t))

    ref_v, ref_t = knowledge_encoding_ref(img, ques_embed, v_relations, hist_embed,
                                          text_rel, params, B, R)
    assert upd_v.shape == (B, R, N, F) and upd_t.shape == (B, R, M, H)
    assert jnp.allclose(upd_v, ref_v, atol=2e-3, rtol=2e-3)
    assert jnp.allclose(upd_t, ref_t, atol=2e-3, rtol=2e-3)
    assert jnp.allclose(full_v, ref_v, atol=3e-3, rtol=3e-3)
    assert jnp.allclose(full_t, ref_t, atol=3e-3, rtol=3e-3)

    print("KERNEL_OK")
</pallas_src>

<mosaic_0001>
module attributes {stable_mosaic.version = 11 : i64} {
  func.func @_identity_kernel(%arg0: i32, %arg1: i32, %arg2: memref<1x8x128xf32, #tpu.memory_space<vmem>>, %arg3: memref<1x1x8x128xf32, #tpu.memory_space<vmem>>, %arg4: memref<1x1x8x128xf32, #tpu.memory_space<vmem>>, %arg5: memref<1x1x8x128xf32, #tpu.memory_space<vmem>>) attributes {dimension_semantics = [#tpu.dimension_semantics<parallel>, #tpu.dimension_semantics<parallel>], iteration_bounds = array<i64: 2, 8>, scalar_prefetch = 0 : i64, scratch_operands = 0 : i64, tpu.core_type = #tpu.core_type<tc>, window_params = [{transform_indices = @transform_0, window_bounds = array<i64: 1, 8, 128>}, {transform_indices = @transform_1, window_bounds = array<i64: 1, 1, 8, 128>}, {transform_indices = @transform_2, window_bounds = array<i64: 1, 1, 8, 128>}, {transform_indices = @transform_3, window_bounds = array<i64: 1, 1, 8, 128>}]} {
    %c0 = arith.constant 0 : index
    %c0_0 = arith.constant 0 : index
    %c0_1 = arith.constant 0 : index
    %0 = vector.load %arg2[%c0, %c0_0, %c0_1] : memref<1x8x128xf32, #tpu.memory_space<vmem>>, vector<1x8x128xf32>
    %1 = vector.shape_cast %0 : vector<1x8x128xf32> to vector<8x128xf32>
    %c0_2 = arith.constant 0 : index
    %c0_3 = arith.constant 0 : index
    %c0_4 = arith.constant 0 : index
    %c0_5 = arith.constant 0 : index
    %2 = vector.load %arg4[%c0_2, %c0_3, %c0_4, %c0_5] : memref<1x1x8x128xf32, #tpu.memory_space<vmem>>, vector<1x1x8x128xf32>
    %3 = vector.shape_cast %2 : vector<1x1x8x128xf32> to vector<8x128xf32>
    %4 = vector.shape_cast %1 : vector<8x128xf32> to vector<1x1x8x128xf32>
    tpu.vector_store %arg4[%c0_2, %c0_3, %c0_4, %c0_5], %4 {strides = array<i32>} : memref<1x1x8x128xf32, #tpu.memory_space<vmem>>, vector<1x1x8x128xf32>,
    %c0_6 = arith.constant 0 : index
    %c0_7 = arith.constant 0 : index
    %c0_8 = arith.constant 0 : index
    %c0_9 = arith.constant 0 : index
    %5 = vector.load %arg3[%c0_6, %c0_7, %c0_8, %c0_9] : memref<1x1x8x128xf32, #tpu.memory_space<vmem>>, vector<1x1x8x128xf32>
    %c0_10 = arith.constant 0 : index
    %c0_11 = arith.constant 0 : index
    %c0_12 = arith.constant 0 : index
    %c0_13 = arith.constant 0 : index
    %6 = vector.load %arg5[%c0_10, %c0_11, %c0_12, %c0_13] : memref<1x1x8x128xf32, #tpu.memory_space<vmem>>, vector<1x1x8x128xf32>
    tpu.vector_store %arg5[%c0_10, %c0_11, %c0_12, %c0_13], %5 {strides = array<i32>} : memref<1x1x8x128xf32, #tpu.memory_space<vmem>>, vector<1x1x8x128xf32>,
    return
  }
  func.func @transform_0(%arg0: i32, %arg1: i32) -> (i32, i32, i32) {
    %c0_i32 = arith.constant 0 : i32
    %c0_i32_0 = arith.constant 0 : i32
    %c0_i32_1 = arith.constant 0 : i32
    return %arg0, %c0_i32, %c0_i32_0 : i32, i32, i32
  }
  func.func @transform_1(%arg0: i32, %arg1: i32) -> (i32, i32, i32, i32) {
    %c0_i32 = arith.constant 0 : i32
    %c0_i32_0 = arith.constant 0 : i32
    %c0_i32_1 = arith.constant 0 : i32
    return %arg0, %arg1, %c0_i32, %c0_i32_0 : i32, i32, i32, i32
  }
  func.func @transform_2(%arg0: i32, %arg1: i32) -> (i32, i32, i32, i32) {
    %c0_i32 = arith.constant 0 : i32
    %c0_i32_0 = arith.constant 0 : i32
    %c0_i32_1 = arith.constant 0 : i32
    return %arg0, %arg1, %c0_i32, %c0_i32_0 : i32, i32, i32, i32
  }
  func.func @transform_3(%arg0: i32, %arg1: i32) -> (i32, i32, i32, i32) {
    %c0_i32 = arith.constant 0 : i32
    %c0_i32_0 = arith.constant 0 : i32
    %c0_i32_1 = arith.constant 0 : i32
    return %arg0, %arg1, %c0_i32, %c0_i32_0 : i32, i32, i32, i32
  }
}

</mosaic_0001>

<bundles_post_ra>
// kernel: tpu_custom_call.1
= control target key start
LH: loop header
LB: loop body
LE: loop exit
PB: predicated region body
PF: predicated region fallthrough
CT: control target
= control target key end

     0   :  { %s1079_s0 = inlined_call_operand.hbm [shape: f32[2,8,128], index: 0, kind: input, shape index: {}]   ;;  %s1080_s1 = inlined_call_operand.hbm [shape: f32[2,8,8,128], index: 1, kind: input, shape index: {}]   ;;  %s1081_s2 = inlined_call_operand.hbm [shape: f32[2,8,8,128], index: 2, kind: output, shape index: {0}]   ;;  %s1082_s3 = inlined_call_operand.hbm [shape: f32[2,8,8,128], index: 3, kind: output, shape index: {1}]  }
   0x1   :  { %1093 = sst [smem:[#allocation19_spill]] %s1079_s0 }
   0x2   :  { %1094 = sst [smem:[#allocation20_spill]] %s1080_s1 }
   0x3   :  { %1095 = sst [smem:[#allocation21_spill]] %s1081_s2 }
   0x4   :  { %1096 = sst [smem:[#allocation22_spill]] %s1082_s3 }
   0x5   :  { %9 = vsyncpa [#allocation3], 0 }
   0x6   :  { %11 = vsyncpa [#allocation3 + $0x1], 0 }
   0x7   :  { %12 = vsyncpa [#allocation6], 0 }
   0x8   :  { %14 = vsyncpa [#allocation6 + $0x1], 0 }
   0x9   :  { %15 = vsyncpa [#allocation4], 0 }
   0xa   :  { %17 = vsyncpa [#allocation4 + $0x1], 0 }
   0xb   :  { %18 = vsyncpa [#allocation9], 0 }
   0xc   :  { %20 = vsyncpa [#allocation9 + $0x1], 0  ;;  %s806_s12 = smov 0   ;;  %s808_s13 = smov 0  }
   0xd   :  { %s810_s14 = smov 0   ;;  %s812_s15 = smov 0  }
   0xe   :  { %s814_s16 = smov 0   ;;  %s816_s17 = smov 0  }
   0xf   :  { %s818_s18 = smov 0   ;;  %s820_s19 = smov 0  }
  0x10   :  { %s822_s20 = smov 0   ;;  %s824_s21 = smov 0  }
  0x11   :  { %s826_s22 = smov 0  }
  0x12 LB: > { %1097 = sst [smem:[#allocation14_spill]] %s740_s12  ;;  %s436_s23 = sadd.s32 4294967295, %s780_s22   ;;  %s780_s22 = sphi %s826_s22, %s26_s22   ;;  %s776_s21 = sphi %s824_s21, %s1133_s21   ;;  %s772_s20 = sphi %s822_s20, %s1132_s20   ;;  %s768_s19 = sphi %s820_s19, %s1131_s19   ;;  %s764_s18 = sphi %s818_s18, %s1130_s18   ;;  %s760_s17 = sphi %s816_s17, %s1129_s17   ;;  %s756_s16 = sphi %s814_s16, %s1128_s16   ;;  %s752_s15 = sphi %s812_s15, %s1127_s15   ;;  %s748_s14 = sphi %s810_s14, %s1126_s14   ;;  %s744_s13 = sphi %s808_s13, %s1125_s13   ;;  %s740_s12 = sphi %s806_s12, %s1124_s12  }
  0x13   : > { %p52_p0 = scmp.ne.s32.totalorder %s760_s17, %s756_s16  ;;  %p53_p1 = scmp.eq.s32.totalorder %s780_s22, 0 }
  0x14   : > { %p58_p2 = scmp.ne.s32.totalorder %s756_s16, %s752_s15  ;;  %p866_p3 = scmp.eq.s32.totalorder %s436_s23, 0 }
  0x15   : > { %p54_p4 = por %p53_p1, %p52_p0  ;;  %p1083_p6 = scmp.lt.s32.totalorder %s780_s22, 16 }
  0x16   : > { %p874_p5 = por %p866_p3, %p58_p2  ;;  %s166_s26 = sand.u32 1, %s760_s17  }
  0x17   : > { %s441_s27 = sshll.u32 %s776_s21, 7  ;;  %s440_s28 = sshll.u32 %s166_s26, 3 }
  0x18   : > { %s1100_s0 = sld [smem:[#allocation19_spill]]  ;;  %s170_s5 = scalar_lea.vmem [#allocation2], %s440_s28 }
  0x19   : > { %s177_s6 = sshll.u32 %s170_s5, 4  ;;  %p886_p7 = pnand %p1083_p6, %p54_p4  ;;  %s178_s6 = int_to_ptr.vmem [resolvable:$true] %s177_s6 }
  0x1a   : > { %p445_p8 = scmp.ge.s32.totalorder %s780_s22, 1  ;;  %p202_p9 = scmp.lt.s32.totalorder %s780_s22, 17 }
  0x1b   : > { %s167_s8 = scalar_lea.sflag [#allocation3], %s166_s26  ;;  %p572_p10 = pneg %p886_p7 }
  0x1c   : > { %s583_s9 = scalar_lea.vmem %s178_s6, 128  ;;  %s782_s10 = smov [#allocation2]  }
  0x1d   : > { %p584_p11 = scmp.ne.s32.totalorder %s178_s6, %s583_s9  ;;  %s588_s11 = sshll.u32 %s782_s10, 4  ;;  %s589_s11 = int_to_ptr.vmem [resolvable:$false] %s588_s11 }
  0x1e   : > { %s175_s4 = scalar_lea.hbm %s1100_s0, %s441_s27  ;;  %s590_s15 = scalar_lea.vmem %s589_s11, 256 }
  0x1f   : > { %p586_p12 = pnand %p584_p11, %p572_p10  ;;  %p591_p0 = scmp.lt.s32.totalorder %s178_s6, %s589_s11 }
  0x20   : > { %p592_p2 = scmp.lt.s32.totalorder %s590_s15, %s583_s9 }
  0x21   : > { %p587_p13 = pneg %p586_p12 }
  0x22   : > { %p593_p4 = por %p592_p2, %p591_p0 }
  0x24   : > { %p594_p6 = pnand %p593_p4, %p587_p13 }
  0x26   : > { %597 = shalt.err (!%p594_p6)
}
  0x27   : > { %469 = dma.hbm_to_vmem [thread:$0]  (!%p886_p7), %s175_s4, 128, %s178_s6, %s167_s8  }
  0x28   : > { %p900_p6 = pnand %p445_p8, %p202_p9  ;;  %s45_s27 = sadd.s32 1, %s760_s17 }
  0x29   : > { %s437_s28 = sadd.s32 4294967294, %s780_s22   ;;  %s35_s29 = sadd.s32 1, %s772_s20 }
  0x2a   : > { %p36_p10 = scmp.ge.s32.totalorder %s35_s29, 8  ;;  %s38_s30 = sadd.s32 1, %s776_s21 }
  0x2b   : > { %s73_s5 = sadd.s32 1, %s748_s14  ;;  %p86_p11 = scmp.ne.s32.totalorder %s744_s13, %s740_s12 }
  0x2c   : > { %s1135_s29 = smov (%p36_p10, %s35_s29), 0  ;;  %s1137_s30 = smov (!%p36_p10, %s38_s30), %s776_s21 }
  0x2d   : > { %1103 = sst [smem:[#allocation15_spill]] %s1135_s29  ;;  %s69_s4 = ssub.s32 %s772_s20, %s1135_s29 }
  0x2e   : > { %p80_p7 = scmp.ne.s32.totalorder %s748_s14, %s744_s13  ;;  %p40_p8 = scmp.ge.s32.totalorder %s1137_s30, 2 }
  0x2f   : > { %p920_p9 = por %p86_p11, %p866_p3  ;;  %p112_p12 = scmp.eq.s32.totalorder %s436_s23, 15 }
  0x30   : > { %p118_p13 = scmp.eq.s32.totalorder %s437_s28, 15  ;;  %s1139_s30 = smov (%p40_p8, %s1137_s30), 0 }
  0x31   : > { %1105 = sst [smem:[#allocation16_spill]] %s1139_s30  ;;  %p928_p0 = por %p112_p12, %p80_p7 }
  0x32   : > { %p932_p2 = por %p118_p13, %p86_p11  ;;  %s42_s24 = ssub.s32 %s776_s21, %s1139_s30 }
  0x33   : > { %s1106_s7 = scalar_select %p928_p0, 1, 0 }
  0x34   : > { %s1108_s8 = scalar_select %p932_p2, 1, 0 }
  0x35   : > { %1107 = sst [smem:[#allocation17_spill]] %s1106_s7  ;;  %p940_p3 = por %p80_p7, %p53_p1 }
  0x36   : > { %1109 = sst [smem:[#allocation18_spill]] %s1108_s8  ;;  %p43_p4 = scmp.eq.s32.totalorder %s42_s24, 0 }
  0x37   : > { %s70_s23 = sor.u32 %s69_s4, %s42_s24  ;;  %s184_s10 = sand.u32 1, %s748_s14  }
  0x38   : > { %p71_p10 = scmp.eq.s32.totalorder %s70_s23, 0  ;;  %s442_s28 = sshll.u32 %s184_s10, 3 }
  0x39   : > { %s946_s11 = scalar_select %p43_p4, %s760_s17, %s45_s27  }
  0x3a   : > { %s949_s15 = scalar_select %p71_p10, %s748_s14, %s73_s5  }
  0x3b   : > { %s443_s0 = sshll.u32 %s776_s21, 3  ;;  %s188_s30 = scalar_lea.vmem [#allocation5], %s442_s28 }
  0x3c   : > { %s193_s29 = sadd.s32 %s772_s20, %s443_s0  ;;  %s197_s12 = sshll.u32 %s188_s30, 4  ;;  %s198_s12 = int_to_ptr.vmem [resolvable:$true] %s197_s12 }
  0x3d   : > { %s444_s8 = sshll.u32 %s193_s29, 7  ;;  %s1111_s1 = sld [smem:[#allocation20_spill]] }
  0x3e   : > { %p1112_p1 = scmp.lt.s32.totalorder %s780_s22, 16  ;;  %s185_s27 = scalar_lea.sflag [#allocation6], %s184_s10 }
  0x3f   : > { %s611_s5 = scalar_lea.vmem %s198_s12, 128  ;;  %s783_s0 = smov [#allocation5]  }
  0x40   : > { %p960_p11 = pnand %p1112_p1, %p940_p3  ;;  %p612_p8 = scmp.ne.s32.totalorder %s198_s12, %s611_s5 }
  0x41   : > { %s616_s29 = sshll.u32 %s783_s0, 4  ;;  %s617_s29 = int_to_ptr.vmem [resolvable:$false] %s616_s29 }
  0x42   : > { %p600_p7 = pneg %p960_p11  ;;  %s618_s2 = scalar_lea.vmem %s617_s29, 256 }
  0x43   : > { %s195_s7 = scalar_lea.hbm %s1111_s1, %s444_s8  ;;  %p619_p4 = scmp.lt.s32.totalorder %s198_s12, %s617_s29 }
  0x44   : > { %p614_p12 = pnand %p612_p8, %p600_p7  ;;  %p620_p10 = scmp.lt.s32.totalorder %s618_s2, %s611_s5 }
  0x46   : > { %p615_p13 = pneg %p614_p12  ;;  %p621_p2 = por %p620_p10, %p619_p4 }
  0x48   : > { %p622_p0 = pnand %p621_p2, %p615_p13 }
  0x4a   : > { %625 = shalt.err (!%p622_p0)
}
  0x4b   : > { %472 = dma.hbm_to_vmem [thread:$0]  (!%p960_p11), %s195_s7, 128, %s198_s12, %s185_s27  }
  0x4c   : > { %206 = sbr.rel (%p900_p6) target bundleno = 137 (0x89), region = 28  ;;  %s208_s3 = sand.u32 (!%p900_p6), 1, %s756_s16  }
  0x4d   : > { %s446_s30 = sshll.u32 (!%p900_p6), %s208_s3, 3  ;;  %s209_s8 = scalar_lea.sflag (!%p900_p6), [#allocation3], %s208_s3 }
  0x4e   : > { %s212_s24 = scalar_lea.vmem (!%p900_p6), [#allocation2], %s446_s30 }
  0x51   : > { %723 = dma.done.wait (%p874_p5), %s209_s8, 128  }
  0x52   : > { %725 = vsyncadd (%p874_p5), %s209_s8, 4294967168  ;;  %s976_s9 = sand.u32 1, %s744_s13  }
  0x53   : > { %s447_s12 = sshll.u32 %s976_s9, 3  ;;  %s218_s26 = scalar_lea.sflag [#allocation6], %s976_s9 }
  0x54   : > { %s221_s7 = scalar_lea.vmem [#allocation5], %s447_s12 }
  0x55   : > { %727 = dma.done.wait (%p920_p9), %s218_s26, 128  }
  0x56   : > { %729 = vsyncadd (%p920_p9), %s218_s26, 4294967168  ;;  %s246_s23 = scalar_lea.vmem [#allocation7], %s447_s12  ;;  %s253_s10 = scalar_lea.vmem [#allocation8], %s447_s12  ;;  %v254_v0 = vld [vmem:[%s212_s24] sm:$0xff]  ;;  %v256_v1 = vld [vmem:[%s221_s7] sm:$0xff] }
  0x57   : > { %s279_s25 = sshll.u32 %s246_s23, 4  ;;  %s1114_s28 = sld [smem:[#allocation17_spill]]  ;;  %255 = vst [vmem:[%s246_s23] sm:$0xff] %v254_v0  ;;  %257 = vst [vmem:[%s253_s10] sm:$0xff] %v256_v1  ;;  %s985_s25 = int_to_ptr.vmem [resolvable:$true] %s279_s25 }
  0x58   : > { %s294_s4 = sshll.u32 %s253_s10, 4  ;;  %s452_s27 = sshll.u32 %s768_s19, 3  ;;  %s988_s4 = int_to_ptr.vmem [resolvable:$true] %s294_s4 }
  0x59   : > { %s275_s5 = sadd.s32 %s764_s18, %s452_s27  ;;  %s1115_s2 = sld [smem:[#allocation21_spill]] }
  0x5a   : > { %s453_s0 = sshll.u32 %s275_s5, 7  ;;  %s1116_s12 = sld [smem:[#allocation22_spill]] }
  0x5b   : > { %s259_s1 = scalar_lea.sflag [#allocation4], %s976_s9  ;;  %s626_s18 = scalar_lea.vmem %s985_s25, 128 }
  0x5c   : > { %p627_p5 = scmp.ne.s32.totalorder %s985_s25, %s626_s18  ;;  %s784_s27 = smov [#allocation7]  }
  0x5d   : > { %p1118_p6 = scmp.ne.s32.totalorder %s1114_s28, 0  ;;  %s630_s5 = sshll.u32 %s784_s27, 4  ;;  %s631_s5 = int_to_ptr.vmem [resolvable:$false] %s630_s5 }
  0x5e   : > { %s632_s29 = scalar_lea.vmem %s631_s5, 256  ;;  %p633_p2 = scmp.lt.s32.totalorder %s985_s25, %s631_s5 }
  0x5f   : > { %s993_s3 = scalar_lea.hbm %s1115_s2, %s453_s0  ;;  %p628_p9 = pnand %p627_p5, %p1118_p6 }
  0x60   : > { %s1117_s26 = smov %s1116_s12  ;;  %s998_s19 = scalar_lea.hbm %s1116_s12, %s453_s0 }
  0x61   : > { %p629_p0 = pneg %p628_p9  ;;  %p634_p3 = scmp.lt.s32.totalorder %s632_s29, %s626_s18 }
  0x63   : > { %p635_p1 = por %p634_p3, %p633_p2 }
  0x65   : > { %p636_p11 = pnand %p635_p1, %p629_p0 }
  0x67   : > { %639 = shalt.err (!%p636_p11)
}
  0x68   : > { %s640_s24 = scalar_lea.hbm %s993_s3, 128  ;;  %s644_s10 = scalar_lea.hbm %s1115_s2, 2048 }
  0x69   : > { %p641_p7 = scmp.ne.s32.totalorder %s993_s3, %s640_s24  ;;  %p645_p13 = scmp.lt.s32.totalorder %s993_s3, %s1115_s2 }
  0x6a   : > { %p646_p4 = scmp.lt.s32.totalorder %s644_s10, %s640_s24 }
  0x6b   : > { %p642_p8 = pnand %p641_p7, %p1118_p6 }
  0x6c   : > { %p647_p10 = por %p646_p4, %p645_p13 }
  0x6d   : > { %p643_p12 = pneg %p642_p8 }
  0x6f   : > { %p648_p5 = pnand %p647_p10, %p643_p12 }
  0x71   : > { %651 = shalt.err (!%p648_p5)
}
  0x72   : > { %462 = dma.vmem_to_hbm [thread:$0]  (%p1118_p6), %s985_s25, 128, %s993_s3, %s259_s1  }
  0x73   : > { %s264_s30 = scalar_lea.sflag [#allocation9], %s976_s9  ;;  %s652_s8 = scalar_lea.vmem %s988_s4, 128 }
  0x74   : > { %p653_p9 = scmp.ne.s32.totalorder %s988_s4, %s652_s8  ;;  %s785_s12 = smov [#allocation8]  }
  0x75   : > { %s656_s18 = sshll.u32 %s785_s12, 4  ;;  %s657_s18 = int_to_ptr.vmem [resolvable:$false] %s656_s18 }
  0x76   : > { %p654_p0 = pnand %p653_p9, %p1118_p6  ;;  %s658_s27 = scalar_lea.vmem %s657_s18, 256 }
  0x77   : > { %p659_p3 = scmp.lt.s32.totalorder %s988_s4, %s657_s18  ;;  %p660_p1 = scmp.lt.s32.totalorder %s658_s27, %s652_s8 }
  0x78   : > { %p655_p2 = pneg %p654_p0 }
  0x79   : > { %p661_p11 = por %p660_p1, %p659_p3 }
  0x7b   : > { %p662_p7 = pnand %p661_p11, %p655_p2 }
  0x7d   : > { %665 = shalt.err (!%p662_p7)
}
  0x7e   : > { %s666_s1 = scalar_lea.hbm %s998_s19, 128  ;;  %s670_s3 = scalar_lea.hbm %s1117_s26, 2048 }
  0x7f   : > { %p667_p8 = scmp.ne.s32.totalorder %s998_s19, %s666_s1  ;;  %p671_p4 = scmp.lt.s32.totalorder %s998_s19, %s1117_s26 }
  0x80   : > { %p672_p10 = scmp.lt.s32.totalorder %s670_s3, %s666_s1 }
  0x81   : > { %p668_p12 = pnand %p667_p8, %p1118_p6 }
  0x82   : > { %p673_p5 = por %p672_p10, %p671_p4 }
  0x83   : > { %p669_p13 = pneg %p668_p12 }
  0x85   : > { %p674_p9 = pnand %p673_p5, %p669_p13 }
  0x87   : > { %677 = shalt.err (!%p674_p9)
}
  0x88   : > { %463 = dma.vmem_to_hbm [thread:$0]  (%p1118_p6), %s988_s4, 128, %s998_s19, %s264_s30  }
  0x89 PF: > { %s1119_s24 = sld [smem:[#allocation14_spill]]  ;;  %p481_p0 = scmp.ge.s32.totalorder %s780_s22, 2 }
  0x8a   : > { %s1120_s7 = sld [smem:[#allocation18_spill]] }
  0x8f   : > { %s306_s23 = sand.u32 1, %s1119_s24  }
  0x90   : > { %p1121_p2 = scmp.ne.s32.totalorder %s1120_s7, 0  ;;  %s307_s10 = scalar_lea.sflag [#allocation4], %s306_s23 }
  0x92   : > { %p474_p3 = pnand %p481_p0, %p1121_p2 }
  0x94   : > { %p475_p1 = pneg %p474_p3 }
  0x96   : > { %731 = dma.done.wait (%p475_p1), %s307_s10, 128  }
  0x97   : > { %733 = vsyncadd (%p475_p1), %s307_s10, 4294967168  ;;  %s316_s0 = scalar_lea.sflag [#allocation9], %s306_s23 }
  0x98   : > { %735 = dma.done.wait (%p475_p1), %s316_s0, 128  }
  0x99   : > { %737 = vsyncadd (%p475_p1), %s316_s0, 4294967168  ;;  %s26_s22 = sadd.s32 1, %s780_s22   ;;  %s1122_s28 = sld [smem:[#allocation15_spill]] }
  0x9a   : > { %p23_p11 = scmp.ge.s32.totalorder %s26_s22, 18   ;;  %s1123_s4 = sld [smem:[#allocation16_spill]] }
  0x9b   : > { %s1124_s12 = smov %s744_s13  ;;  %s1125_s13 = smov %s748_s14 }
  0x9c   : > { %s1126_s14 = smov %s949_s15  ;;  %s1127_s15 = smov %s756_s16 }
  0x9d   : > { %s1128_s16 = smov %s760_s17  ;;  %s1129_s17 = smov %s946_s11 }
  0x9e   : > { %s1130_s18 = smov %s772_s20  ;;  %s1131_s19 = smov %s776_s21 }
  0x9f   : > { %s1132_s20 = smov %s1122_s28  ;;  %25 = sbr.rel (!%p23_p11) target bundleno = 18 (0x12), region = 103 }
  0xa0   : > { %s1133_s21 = smov %s1123_s4 }
  0xa4   :  { %321 = vsyncpa [#allocation3], 1 }
  0xa5   :  { %323 = vsyncpa [#allocation3 + $0x1], 1 }
  0xa6   :  { %324 = vsyncpa [#allocation6], 1 }
  0xa7   :  { %326 = vsyncpa [#allocation6 + $0x1], 1 }
  0xa8   :  { %327 = vsyncpa [#allocation4], 1 }
  0xa9   :  { %329 = vsyncpa [#allocation4 + $0x1], 1 }
  0xaa   :  { %330 = vsyncpa [#allocation9], 1 }
  0xab   :  { %332 = vsyncpa [#allocation9 + $0x1], 1 }

</bundles_post_ra>
